<compile_context>
chip_gen: v7x
topology: tpu7x:2x2x1
jax: 0.10.0
libtpu: 0.0.40
codegen_flags: <defaults>
</compile_context>

<pallas_src>
import functools
import math

import jax
import jax.numpy as jnp
from jax.experimental import pallas as pl
from jax.experimental.pallas import tpu as pltpu


# ============================ Pallas kernel ============================

def _concat_kernel(*refs, sizes):
    """Write each input block into its disjoint lane-slice of the output block.

    refs = (*in_refs, out_ref); `sizes` are the static lane widths of the
    inputs.  Slices are static, so each store is a single wide (lane-dense)
    vector store -- the concat itself is free.
    """
    *in_refs, o_ref = refs
    off = 0
    for r, sz in zip(in_refs, sizes):
        o_ref[:, off:off + sz] = r[...].astype(o_ref.dtype)
        off += sz


# ============================ wrapper ============================

def concat(xs, dim=1):
    """torch.cat(xs, dim) for same-rank arrays (all dims equal except `dim`)."""
    xs = [jnp.asarray(x) for x in xs]
    nd = xs[0].ndim
    d = dim % nd
    out_dtype = jnp.result_type(*[x.dtype for x in xs])

    lead = xs[0].shape[:d]
    trail = xs[0].shape[d + 1:]
    outer = math.prod(lead) if lead else 1
    inner = math.prod(trail) if trail else 1

    # Lane-dense 2-D views: (outer, C_i * inner).  For a fixed leading index
    # the (C_i, *trail) block is contiguous, so concatenating the flattened
    # blocks along the last axis reproduces torch.cat along `dim` exactly.
    feats = [x.shape[d] * inner for x in xs]
    feat_total = sum(feats)
    xs2d = [x.reshape(outer, f) for x, f in zip(xs, feats)]

    # Row-tile size: biggest power-of-two multiple of 8 that divides `outer`
    # and keeps one pipeline stage (all input chunks + output block) under
    # ~8 MiB, leaving double-buffering headroom even on v7x's 64 MiB VMEM.
    itemsize = jnp.dtype(out_dtype).itemsize
    bytes_per_row = 2 * feat_total * itemsize  # input slices + output block
    max_rows = max(8, (8 * 1024 * 1024) // max(bytes_per_row, 1))
    if outer > 8 and outer % 8 == 0:
        tile_n = 8
        while tile_n * 2 <= max_rows and outer % (tile_n * 2) == 0:
            tile_n *= 2
    else:
        # TODO(synk): if `outer` is both huge and not a multiple of 8, this
        # falls back to a single (possibly VMEM-heavy) block.
        tile_n = outer
    grid = (outer // tile_n,)

    in_specs = [pl.BlockSpec((tile_n, f), lambda i: (i, 0)) for f in feats]
    out_spec = pl.BlockSpec((tile_n, feat_total), lambda i: (i, 0))

    out2d = pl.pallas_call(
        functools.partial(_concat_kernel, sizes=tuple(feats)),
        out_shape=jax.ShapeDtypeStruct((outer, feat_total), out_dtype),
        grid=grid,
        in_specs=in_specs,
        out_specs=out_spec,
        compiler_params=pltpu.CompilerParams(
            dimension_semantics=("parallel",),  # megacore sharding on v7x
            vmem_limit_bytes=64 * 1024 * 1024,
        ),
    )(*xs2d)

    c_total = sum(x.shape[d] for x in xs)
    return out2d.reshape(*lead, c_total, *trail)


# ================================ main ================================

if __name__ == "__main__":
    key = jax.random.PRNGKey(0)
    k1, k2, k3 = jax.random.split(key, 3)

    # Small NCHW inputs consistent with the module (concat along channels).
    x1 = jax.random.normal(k1, (2, 4, 16, 16), jnp.float32)
    x2 = jax.random.normal(k2, (2, 3, 16, 16), jnp.float32)
    x3 = jax.random.normal(k3, (2, 9, 16, 16), jnp.float32)

    fwd = jax.jit(lambda a, b, c: concat([a, b, c], 1))
    out = fwd(x1, x2, x3)
    jax.block_until_ready(out)

    assert out.shape == (2, 16, 16, 16), out.shape
    ref = jnp.concatenate([x1, x2, x3], axis=1)
    assert bool(jnp.array_equal(out, ref)), "mismatch vs jnp.concatenate reference"
    print("KERNEL_OK")
</pallas_src>

<mosaic_0001>
module attributes {stable_mosaic.version = 11 : i64} {
  func.func @_concat_kernel(%arg0: i32, %arg1: memref<2x1024xf32, #tpu.memory_space<vmem>>, %arg2: memref<2x768xf32, #tpu.memory_space<vmem>>, %arg3: memref<2x2304xf32, #tpu.memory_space<vmem>>, %arg4: memref<2x4096xf32, #tpu.memory_space<vmem>>) attributes {dimension_semantics = [#tpu.dimension_semantics<parallel>], iteration_bounds = array<i64: 1>, scalar_prefetch = 0 : i64, scratch_operands = 0 : i64, tpu.core_type = #tpu.core_type<tc>, window_params = [{transform_indices = @transform_0, window_bounds = array<i64: 2, 1024>}, {transform_indices = @transform_1, window_bounds = array<i64: 2, 768>}, {transform_indices = @transform_2, window_bounds = array<i64: 2, 2304>}, {transform_indices = @transform_3, window_bounds = array<i64: 2, 4096>}]} {
    %c0 = arith.constant 0 : index
    %c0_0 = arith.constant 0 : index
    %0 = vector.load %arg1[%c0, %c0_0] : memref<2x1024xf32, #tpu.memory_space<vmem>>, vector<2x1024xf32>
    %c0_1 = arith.constant 0 : index
    %c0_2 = arith.constant 0 : index
    %1 = vector.load %arg4[%c0_1, %c0_2] : memref<2x4096xf32, #tpu.memory_space<vmem>>, vector<2x1024xf32>
    tpu.vector_store %arg4[%c0_1, %c0_2], %0 {strides = array<i32>} : memref<2x4096xf32, #tpu.memory_space<vmem>>, vector<2x1024xf32>,
    %c0_3 = arith.constant 0 : index
    %c0_4 = arith.constant 0 : index
    %2 = vector.load %arg2[%c0_3, %c0_4] : memref<2x768xf32, #tpu.memory_space<vmem>>, vector<2x768xf32>
    %c0_5 = arith.constant 0 : index
    %c1024 = arith.constant 1024 : index
    %3 = vector.load %arg4[%c0_5, %c1024] : memref<2x4096xf32, #tpu.memory_space<vmem>>, vector<2x768xf32>
    tpu.vector_store %arg4[%c0_5, %c1024], %2 {strides = array<i32>} : memref<2x4096xf32, #tpu.memory_space<vmem>>, vector<2x768xf32>,
    %c0_6 = arith.constant 0 : index
    %c0_7 = arith.constant 0 : index
    %4 = vector.load %arg3[%c0_6, %c0_7] : memref<2x2304xf32, #tpu.memory_space<vmem>>, vector<2x2304xf32>
    %c0_8 = arith.constant 0 : index
    %c1792 = arith.constant 1792 : index
    %5 = vector.load %arg4[%c0_8, %c1792] : memref<2x4096xf32, #tpu.memory_space<vmem>>, vector<2x2304xf32>
    tpu.vector_store %arg4[%c0_8, %c1792], %4 {strides = array<i32>} : memref<2x4096xf32, #tpu.memory_space<vmem>>, vector<2x2304xf32>,
    return
  }
  func.func @transform_0(%arg0: i32) -> (i32, i32) {
    %c0_i32 = arith.constant 0 : i32
    %c0_i32_0 = arith.constant 0 : i32
    return %arg0, %c0_i32 : i32, i32
  }
  func.func @transform_1(%arg0: i32) -> (i32, i32) {
    %c0_i32 = arith.constant 0 : i32
    %c0_i32_0 = arith.constant 0 : i32
    return %arg0, %c0_i32 : i32, i32
  }
  func.func @transform_2(%arg0: i32) -> (i32, i32) {
    %c0_i32 = arith.constant 0 : i32
    %c0_i32_0 = arith.constant 0 : i32
    return %arg0, %c0_i32 : i32, i32
  }
  func.func @transform_3(%arg0: i32) -> (i32, i32) {
    %c0_i32 = arith.constant 0 : i32
    %c0_i32_0 = arith.constant 0 : i32
    return %arg0, %c0_i32 : i32, i32
  }
}

</mosaic_0001>

<bundles_post_ra>
// kernel: _lambda_.1
= control target key start
LH: loop header
LB: loop body
LE: loop exit
PB: predicated region body
PF: predicated region fallthrough
CT: control target
= control target key end

     0   :  { %8 = vsyncpa [#allocation3], 0  ;;  %s254_s0 = inlined_call_operand.hbm [shape: f32[2,1024], index: 0, kind: input, shape index: {}]   ;;  %s255_s1 = inlined_call_operand.hbm [shape: f32[2,768], index: 1, kind: input, shape index: {}]   ;;  %s256_s2 = inlined_call_operand.hbm [shape: f32[2,2304], index: 2, kind: input, shape index: {}]   ;;  %s257_s3 = inlined_call_operand.hbm [shape: f32[2,4096], index: 3, kind: output, shape index: {}]  }
   0x1   :  { %9 = vsyncpa [#allocation6], 0 }
   0x2   :  { %10 = vsyncpa [#allocation4], 0  ;;  %s182_s12 = smov [#allocation5]   ;;  %s183_s14 = smov [#allocation2]  }
   0x3   :  { %s27_s13 = sshll.u32 %s182_s12, 4  ;;  %s17_s15 = sshll.u32 %s183_s14, 4  ;;  %s28_s13 = int_to_ptr.vmem [resolvable:$true] %s27_s13  ;;  %s18_s15 = int_to_ptr.vmem [resolvable:$true] %s17_s15 }
   0x4   :  { %s88_s18 = scalar_lea.hbm %s255_s1, 192 }
   0x5   :  { %p89_p0 = scmp.ne.s32.totalorder %s255_s1, %s88_s18  ;;  %p92_p1 = scmp.lt.u32.totalorder %s88_s18, %s255_s1 }
   0x7   :  { %p94_p2 = pnand %p92_p1, %p89_p0 }
   0x9   :  { %97 = shalt.err (!%p94_p2)
}
   0xa   :  { %s98_s23 = scalar_lea.vmem %s28_s13, 192  ;;  %p103_p4 = scmp.lt.s32.totalorder %s28_s13, %s28_s13 }
   0xb   :  { %p99_p3 = scmp.ne.s32.totalorder %s28_s13, %s98_s23  ;;  %p104_p5 = scmp.lt.s32.totalorder %s98_s23, %s98_s23 }
   0xd   :  { %p105_p6 = por %p104_p5, %p103_p4 }
   0xf   :  { %p106_p7 = pnand %p105_p6, %p99_p3 }
  0x11   :  { %109 = shalt.err (!%p106_p7)
}
  0x12   :  { %30 = dma.hbm_to_vmem [thread:$0]  %s255_s1, 192, %s28_s13, [#allocation6]  }
  0x13   :  { %s110_s28 = scalar_lea.hbm %s254_s0, 256 }
  0x14   :  { %p111_p8 = scmp.ne.s32.totalorder %s254_s0, %s110_s28  ;;  %p114_p9 = scmp.lt.u32.totalorder %s110_s28, %s254_s0 }
  0x16   :  { %p116_p10 = pnand %p114_p9, %p111_p8 }
  0x18   :  { %119 = shalt.err (!%p116_p10)
}
  0x19   :  { %s120_s6 = scalar_lea.vmem %s18_s15, 256  ;;  %p125_p12 = scmp.lt.s32.totalorder %s18_s15, %s18_s15 }
  0x1a   :  { %p121_p11 = scmp.ne.s32.totalorder %s18_s15, %s120_s6  ;;  %p126_p13 = scmp.lt.s32.totalorder %s120_s6, %s120_s6 }
  0x1c   :  { %p127_p0 = por %p126_p13, %p125_p12 }
  0x1e   :  { %p128_p1 = pnand %p127_p0, %p121_p11 }
  0x20   :  { %131 = shalt.err (!%p128_p1)
}
  0x21   :  { %20 = dma.hbm_to_vmem [thread:$0]  %s254_s0, 256, %s18_s15, [#allocation3]  }
  0x22   :  { %s184_s8 = smov [#allocation7]   ;;  %s132_s12 = scalar_lea.hbm %s256_s2, 576 }
  0x23   :  { %s37_s9 = sshll.u32 %s184_s8, 4  ;;  %p133_p2 = scmp.ne.s32.totalorder %s256_s2, %s132_s12  ;;  %s38_s9 = int_to_ptr.vmem [resolvable:$true] %s37_s9 }
  0x24   :  { %p136_p3 = scmp.lt.u32.totalorder %s132_s12, %s256_s2 }
  0x26   :  { %p138_p4 = pnand %p136_p3, %p133_p2 }
  0x28   :  { %141 = shalt.err (!%p138_p4)
}
  0x29   :  { %s142_s18 = scalar_lea.vmem %s38_s9, 576  ;;  %p147_p6 = scmp.lt.s32.totalorder %s38_s9, %s38_s9 }
  0x2a   :  { %p143_p5 = scmp.ne.s32.totalorder %s38_s9, %s142_s18  ;;  %p148_p7 = scmp.lt.s32.totalorder %s142_s18, %s142_s18 }
  0x2c   :  { %p149_p8 = por %p148_p7, %p147_p6 }
  0x2e   :  { %p150_p9 = pnand %p149_p8, %p143_p5 }
  0x30   :  { %153 = shalt.err (!%p150_p9)
}
  0x31   :  { %40 = dma.hbm_to_vmem [thread:$0]  %s256_s2, 576, %s38_s9, [#allocation6]  }
  0x32   :  { %176 = dma.done.wait [#allocation3], 256  }
  0x33   :  { %177 = vsyncadd [#allocation3], 4294967040 }
  0x34   :  { %178 = dma.done.wait [#allocation6], 768  }
  0x35   :  { %179 = vsyncadd [#allocation6], 4294966528  ;;  %s185_s19 = smov [#allocation8]   ;;  %v50_v0 = vld [vmem:[#allocation2] sm:$0xff]  ;;  %v51_v1 = vld [vmem:[#allocation2 + $0x8] sm:$0xff] }
  0x36   :  { %s74_s20 = sshll.u32 %s185_s19, 4  ;;  %v54_v2 = vld [vmem:[#allocation5] sm:$0xff]  ;;  %52 = vst [vmem:[#allocation8] sm:$0xff] %v50_v0  ;;  %53 = vst [vmem:[#allocation8 + $0x8] sm:$0xff] %v51_v1  ;;  %v55_v3 = vld [vmem:[#allocation5 + $0x8] sm:$0xf]  ;;  %s75_s20 = int_to_ptr.vmem [resolvable:$true] %s74_s20 }
  0x37   :  { %56 = vst [vmem:[#allocation8 + $0x10] sm:$0xff] %v54_v2  ;;  %v58_v4 = vld [vmem:[#allocation7] sm:$0xff]  ;;  %v59_v5 = vld [vmem:[#allocation7 + $0x8] sm:$0xff]  ;;  %57 = vst [vmem:[#allocation8 + $0x18] sm:$0xf] %v55_v3  ;;  %s154_s2 = scalar_lea.vmem %s75_s20, 1024  ;;  %p159_p11 = scmp.lt.s32.totalorder %s75_s20, %s75_s20 }
  0x38   :  { %63 = vst [vmem:[#allocation8 + $0x1c] sm:$0xff] %v58_v4  ;;  %64 = vst [vmem:[#allocation8 + $0x24] sm:$0xff] %v59_v5  ;;  %v60_v6 = vld [vmem:[#allocation7 + $0x10] sm:$0xff]  ;;  %v61_v7 = vld [vmem:[#allocation7 + $0x18] sm:$0xff]  ;;  %p155_p10 = scmp.ne.s32.totalorder %s75_s20, %s154_s2  ;;  %p160_p12 = scmp.lt.s32.totalorder %s154_s2, %s154_s2 }
  0x39   :  { %v62_v8 = vld [vmem:[#allocation7 + $0x20] sm:$0xf]  ;;  %65 = vst [vmem:[#allocation8 + $0x2c] sm:$0xff] %v60_v6  ;;  %66 = vst [vmem:[#allocation8 + $0x34] sm:$0xff] %v61_v7 }
  0x3a   :  { %67 = vst [vmem:[#allocation8 + $0x3c] sm:$0xf] %v62_v8  ;;  %p161_p13 = por %p160_p12, %p159_p11 }
  0x3c   :  { %p162_p0 = pnand %p161_p13, %p155_p10 }
  0x3e   :  { %165 = shalt.err (!%p162_p0)
}
  0x3f   :  { %s166_s23 = scalar_lea.hbm %s257_s3, 1024 }
  0x40   :  { %p167_p1 = scmp.ne.s32.totalorder %s257_s3, %s166_s23  ;;  %p170_p2 = scmp.lt.u32.totalorder %s166_s23, %s257_s3 }
  0x42   :  { %p172_p3 = pnand %p170_p2, %p167_p1 }
  0x44   :  { %175 = shalt.err (!%p172_p3)
}
  0x45   :  { %77 = dma.vmem_to_hbm [thread:$0]  %s75_s20, 1024, %s257_s3, [#allocation4]  }
  0x46   :  { %180 = dma.done.wait [#allocation4], 1024  }
  0x47   :  { %181 = vsyncadd [#allocation4], 4294966272 }
  0x48   :  { %81 = vsyncpa [#allocation3], 1 }
  0x49   :  { %82 = vsyncpa [#allocation6], 1 }
  0x4a   :  { %83 = vsyncpa [#allocation4], 1 }

</bundles_post_ra>
